<compile_context>
chip_gen: v5e
topology: v5e:2x2
jax: 0.10.0
libtpu: 0.0.40
codegen_flags: <defaults>
</compile_context>

<pallas_src>
import functools

import jax
import jax.numpy as jnp
from jax.experimental import pallas as pl
from jax.experimental.pallas import tpu as pltpu


_VMEM_BUDGET = 32 * 1024 * 1024   # sizing target: blocks + f32 temporaries
_VMEM_LIMIT = 48 * 1024 * 1024    # scoped-VMEM limit (v7x-safe, > defaults)


# ---------------------------------------------------------------------------
# rank == 2 path: x is (rows, C), classes on the lane axis.
# ---------------------------------------------------------------------------
def _hloss_2d_kernel(x_ref, o_ref, *, n_rows, tb):
    i = pl.program_id(0)
    x = x_ref[...].astype(jnp.float32)                       # (tb, C)
    m = jnp.max(x, axis=1, keepdims=True)                    # (tb, 1)
    shifted = x - m
    e = jnp.exp(shifted)
    s = jnp.sum(e, axis=1, keepdims=True)                    # (tb, 1)
    dot = jnp.sum(e * shifted, axis=1, keepdims=True)        # (tb, 1)
    ent = dot / s - jnp.log(s)                               # sum_c p*logp
    # Mask rows beyond the real row count (last partial block / no wrapper pad).
    row = i * tb + jax.lax.broadcasted_iota(jnp.int32, (tb, 1), 0)
    ent = jnp.where(row < n_rows, ent, 0.0)
    o_ref[...] = jnp.sum(ent, keepdims=True)[None]           # (1, 1, 1) partial


def _hloss_2d(x, block_rows):
    n_rows, c = x.shape
    itemsize = jnp.dtype(x.dtype).itemsize
    # Budget: 2x double-buffered native-dtype input + ~3 full-tile f32 temps.
    per_row = c * (2 * itemsize + 12)
    tb = (_VMEM_BUDGET // per_row) if block_rows is None else block_rows
    tb = max(16, (tb // 16) * 16)
    if tb >= n_rows:
        tb = n_rows                      # single block == full dims (legal)
    num_tiles = pl.cdiv(n_rows, tb)

    cost = pl.CostEstimate(
        flops=6 * n_rows * c,
        transcendentals=n_rows * c + n_rows,
        bytes_accessed=n_rows * c * itemsize + num_tiles * 4,
    )
    partials = pl.pallas_call(
        functools.partial(_hloss_2d_kernel, n_rows=n_rows, tb=tb),
        out_shape=jax.ShapeDtypeStruct((num_tiles, 1, 1), jnp.float32),
        grid_spec=pltpu.PrefetchScalarGridSpec(
            num_scalar_prefetch=0,
            grid=(num_tiles,),
            in_specs=[pl.BlockSpec((tb, c), lambda i: (i, 0))],
            out_specs=pl.BlockSpec((1, 1, 1), lambda i: (i, 0, 0)),
        ),
        compiler_params=pltpu.CompilerParams(
            dimension_semantics=("parallel",),
            vmem_limit_bytes=_VMEM_LIMIT,
        ),
        cost_estimate=cost,
    )(x)
    return -jnp.sum(partials) / n_rows


# ---------------------------------------------------------------------------
# rank > 2 path: x is (N, C, S); classes on sublanes, spatial on lanes.
# ---------------------------------------------------------------------------
def _hloss_nd_kernel(x_ref, o_ref, *, n_batch, n_spatial, tn, ts):
    i = pl.program_id(0)                                     # batch-tile index
    j = pl.program_id(1)                                     # spatial-tile index
    x = x_ref[...].astype(jnp.float32)                       # (tn, C, ts)
    m = jnp.max(x, axis=1, keepdims=True)                    # (tn, 1, ts)
    shifted = x - m
    e = jnp.exp(shifted)
    s = jnp.sum(e, axis=1, keepdims=True)                    # (tn, 1, ts)
    dot = jnp.sum(e * shifted, axis=1, keepdims=True)        # (tn, 1, ts)
    ent = dot / s - jnp.log(s)                               # sum_c p*logp
    # Mask batch / spatial positions of the partial last blocks.
    bidx = i * tn + jax.lax.broadcasted_iota(jnp.int32, (tn, 1, 1), 0)
    sidx = j * ts + jax.lax.broadcasted_iota(jnp.int32, (1, 1, ts), 2)
    ent = jnp.where((bidx < n_batch) & (sidx < n_spatial), ent, 0.0)
    o_ref[...] = jnp.sum(ent, keepdims=True)[None]           # (1,1,1,1) partial


def _pick_spatial_tile(s, want):
    want = min(want, s)
    if want >= s:
        return s                   # full spatial extent: always a legal block
    ts = (want // 128) * 128       # tiled: lane dim must be a multiple of 128
    return ts if ts >= 128 else s


def _hloss_nd(x, block_batch, block_spatial):
    n, c, s = x.shape
    itemsize = jnp.dtype(x.dtype).itemsize
    per_elem = c * (2 * itemsize + 12)        # per (batch, spatial) location
    max_elems = max(1, _VMEM_BUDGET // per_elem)

    ts = _pick_spatial_tile(s, max_elems if block_spatial is None else block_spatial)
    if block_batch is None:
        tn = max(1, min(n, max_elems // ts))
    else:
        tn = max(1, min(n, block_batch))
    nb = pl.cdiv(n, tn)
    sb = pl.cdiv(s, ts)

    cost = pl.CostEstimate(
        flops=6 * n * s * c,
        transcendentals=n * s * c + n * s,
        bytes_accessed=n * c * s * itemsize + nb * sb * 4,
    )
    partials = pl.pallas_call(
        functools.partial(_hloss_nd_kernel, n_batch=n, n_spatial=s, tn=tn, ts=ts),
        out_shape=jax.ShapeDtypeStruct((nb, sb, 1, 1), jnp.float32),
        grid_spec=pltpu.PrefetchScalarGridSpec(
            num_scalar_prefetch=0,
            grid=(nb, sb),
            in_specs=[pl.BlockSpec((tn, c, ts), lambda i, j: (i, 0, j))],
            out_specs=pl.BlockSpec((1, 1, 1, 1), lambda i, j: (i, j, 0, 0)),
        ),
        compiler_params=pltpu.CompilerParams(
            dimension_semantics=("parallel", "parallel"),
            vmem_limit_bytes=_VMEM_LIMIT,
        ),
        cost_estimate=cost,
    )(x)
    return -jnp.sum(partials) / (n * s)


# ---------------------------------------------------------------------------
# Public entry point.
# ---------------------------------------------------------------------------
@functools.partial(
    jax.jit, static_argnames=("block_rows", "block_batch", "block_spatial"))
def hloss(x, *, block_rows=None, block_batch=None, block_spatial=None):
    """-mean over all non-class positions of sum_c softmax(x)*log_softmax(x), dim=1."""
    if x.ndim < 2:
        raise ValueError("HLoss expects the class axis at dim=1 (rank >= 2).")
    if x.ndim == 2:
        return _hloss_2d(x, block_rows)
    n, c = x.shape[0], x.shape[1]
    s = 1
    for d in x.shape[2:]:
        s *= d
    if s == 1:
        return _hloss_2d(x.reshape(n, c), block_rows)
    # Free reshape (no HBM transpose): classes stay on dim 1, spatial flattened.
    return _hloss_nd(x.reshape(n, c, s), block_batch, block_spatial)


def _hloss_ref(x):
    # Pure-JAX reference mirroring the PyTorch module.
    logp = jax.nn.log_softmax(x.astype(jnp.float32), axis=1)
    p = jnp.exp(logp)
    return -1.0 * jnp.mean(jnp.sum(p * logp, axis=1))


if __name__ == "__main__":
    key = jax.random.PRNGKey(0)
    k1, k2, k3 = jax.random.split(key, 3)

    # Test 1: 4D NCHW logits (typical use of the module) -> ND path, one tile,
    # spatial on lanes (C=4 stays fully dense on the lane axis now).
    x1 = jax.random.normal(k1, (2, 4, 16, 16), dtype=jnp.float32)
    out1 = jax.block_until_ready(hloss(x1))
    ref1 = _hloss_ref(x1)
    assert jnp.allclose(out1, ref1, rtol=1e-5, atol=1e-5), (out1, ref1)

    # Test 2: 2D bf16 logits with a row count that is not a multiple of the
    # forced tile -> multi-tile 2D path + partial-last-block masking (no pad).
    x2 = jax.random.normal(k2, (300, 256), dtype=jnp.bfloat16)
    out2 = jax.block_until_ready(hloss(x2, block_rows=128))
    ref2 = _hloss_ref(x2)
    assert jnp.allclose(out2, ref2, rtol=1e-5, atol=1e-5), (out2, ref2)

    # Test 3: 4D with forced small tiles -> exercises both batch-tail and
    # spatial-tail masking on the ND path (N % tn != 0, S % ts != 0).
    x3 = jax.random.normal(k3, (5, 7, 24, 24), dtype=jnp.float32)   # S = 576
    out3 = jax.block_until_ready(hloss(x3, block_batch=2, block_spatial=128))
    ref3 = _hloss_ref(x3)
    assert jnp.allclose(out3, ref3, rtol=1e-5, atol=1e-5), (out3, ref3)

    print("KERNEL_OK")
</pallas_src>

<mosaic_0001>
module attributes {stable_mosaic.version = 11 : i64} {
  func.func @_hloss_nd_kernel(%arg0: i32, %arg1: i32, %arg2: memref<2x4x256xf32, #tpu.memory_space<vmem>>, %arg3: memref<1x1x1x1xf32, #tpu.memory_space<vmem>>) attributes {dimension_semantics = [#tpu.dimension_semantics<parallel>, #tpu.dimension_semantics<parallel>], iteration_bounds = array<i64: 1, 1>, scalar_prefetch = 0 : i64, scratch_operands = 0 : i64, tpu.core_type = #tpu.core_type<tc>, window_params = [{transform_indices = @transform_0, window_bounds = array<i64: 2, 4, 256>}, {transform_indices = @transform_1, window_bounds = array<i64: 1, 1, 1, 1>}]} {
    %c0 = arith.constant 0 : index
    %c0_0 = arith.constant 0 : index
    %c0_1 = arith.constant 0 : index
    %0 = vector.load %arg2[%c0, %c0_0, %c0_1] : memref<2x4x256xf32, #tpu.memory_space<vmem>>, vector<2x4x256xf32>
    %cst = arith.constant dense<0xFF800000> : vector<2x256xf32>
    %1 = vector.multi_reduction <maximumf>, %0, %cst [1] : vector<2x4x256xf32> to vector<2x256xf32>
    %2 = vector.shape_cast %1 : vector<2x256xf32> to vector<2x1x256xf32>
    %3 = vector.broadcast %2 : vector<2x1x256xf32> to vector<2x4x256xf32>
    %4 = arith.subf %0, %3 : vector<2x4x256xf32>
    %5 = math.exp %4 : vector<2x4x256xf32>
    %cst_2 = arith.constant dense<0.000000e+00> : vector<2x256xf32>
    %6 = vector.multi_reduction <add>, %5, %cst_2 [1] : vector<2x4x256xf32> to vector<2x256xf32>
    %7 = vector.shape_cast %6 : vector<2x256xf32> to vector<2x1x256xf32>
    %8 = arith.mulf %5, %4 : vector<2x4x256xf32>
    %cst_3 = arith.constant dense<0.000000e+00> : vector<2x256xf32>
    %9 = vector.multi_reduction <add>, %8, %cst_3 [1] : vector<2x4x256xf32> to vector<2x256xf32>
    %10 = vector.shape_cast %9 : vector<2x256xf32> to vector<2x1x256xf32>
    %11 = arith.divf %10, %7 : vector<2x1x256xf32>
    %12 = math.log %7 : vector<2x1x256xf32>
    %13 = arith.subf %11, %12 : vector<2x1x256xf32>
    %c2_i32 = arith.constant 2 : i32
    %14 = arith.muli %arg0, %c2_i32 : i32
    %15 = tpu.iota {dimensions = array<i32: 0>} : vector<2x1x1xi32>
    %16 = vector.broadcast %14 : i32 to vector<2x1x1xi32>
    %17 = arith.addi %16, %15 : vector<2x1x1xi32>
    %c256_i32 = arith.constant 256 : i32
    %18 = arith.muli %arg1, %c256_i32 : i32
    %19 = tpu.iota {dimensions = array<i32: 2>} : vector<1x1x256xi32>
    %20 = vector.broadcast %18 : i32 to vector<1x1x256xi32>
    %21 = arith.addi %20, %19 : vector<1x1x256xi32>
    %c2_i32_4 = arith.constant 2 : i32
    %22 = vector.broadcast %c2_i32_4 : i32 to vector<2x1x1xi32>
    %23 = arith.cmpi slt, %17, %22 : vector<2x1x1xi32>
    %c256_i32_5 = arith.constant 256 : i32
    %24 = vector.broadcast %c256_i32_5 : i32 to vector<1x1x256xi32>
    %25 = arith.cmpi slt, %21, %24 : vector<1x1x256xi32>
    %26 = vector.broadcast %23 : vector<2x1x1xi1> to vector<2x1x256xi1>
    %27 = vector.broadcast %25 : vector<1x1x256xi1> to vector<2x1x256xi1>
    %28 = arith.andi %26, %27 : vector<2x1x256xi1>
    %cst_6 = arith.constant 0.000000e+00 : f32
    %29 = vector.broadcast %cst_6 : f32 to vector<2x1x256xf32>
    %30 = arith.select %28, %13, %29 : vector<2x1x256xi1>, vector<2x1x256xf32>
    %31 = vector.shape_cast %30 : vector<2x1x256xf32> to vector<1x2x1x256xf32>
    %cst_7 = arith.constant dense<0.000000e+00> : vector<1xf32>
    %32 = vector.multi_reduction <add>, %31, %cst_7 [1, 2, 3] : vector<1x2x1x256xf32> to vector<1xf32>
    %33 = vector.shape_cast %32 : vector<1xf32> to vector<1x1x1x1xf32>
    %34 = vector.extract %33[0, 0, 0, 0] : f32 from vector<1x1x1x1xf32>
    %35 = vector.broadcast %34 : f32 to vector<1x1x1xf32>
    %36 = vector.shape_cast %35 : vector<1x1x1xf32> to vector<1x1x1x1xf32>
    %c0_8 = arith.constant 0 : index
    %c0_9 = arith.constant 0 : index
    %c0_10 = arith.constant 0 : index
    %c0_11 = arith.constant 0 : index
    %37 = vector.load %arg3[%c0_8, %c0_9, %c0_10, %c0_11] : memref<1x1x1x1xf32, #tpu.memory_space<vmem>>, vector<1x1x1x1xf32>
    tpu.vector_store %arg3[%c0_8, %c0_9, %c0_10, %c0_11], %36 {strides = array<i32>} : memref<1x1x1x1xf32, #tpu.memory_space<vmem>>, vector<1x1x1x1xf32>,
    return
  }
  func.func @transform_0(%arg0: i32, %arg1: i32) -> (i32, i32, i32) {
    %c0_i32 = arith.constant 0 : i32
    %c0_i32_0 = arith.constant 0 : i32
    return %arg0, %c0_i32, %arg1 : i32, i32, i32
  }
  func.func @transform_1(%arg0: i32, %arg1: i32) -> (i32, i32, i32, i32) {
    %c0_i32 = arith.constant 0 : i32
    %c0_i32_0 = arith.constant 0 : i32
    %c0_i32_1 = arith.constant 0 : i32
    return %arg0, %arg1, %c0_i32, %c0_i32_0 : i32, i32, i32, i32
  }
}

</mosaic_0001>

<bundles_post_ra>
// kernel: hloss.1
= control target key start
LH: loop header
LB: loop body
LE: loop exit
PB: predicated region body
PF: predicated region fallthrough
CT: control target
= control target key end

     0   :  { %s451_s0 = inlined_call_operand.vmem [shape: f32[2,4,256], index: 0, kind: input, shape index: {}]   ;;  %s452_s1 = inlined_call_operand.hbm [shape: f32[1,1,1,1], index: 1, kind: output, shape index: {}]  }
   0x1   :  { %v9_v0 = vld [vmem:[%s451_s0] sm:$0xff]  ;;  %v10_v1 = vld [vmem:[%s451_s0 + $0x8] sm:$0xff] }
   0x2   :  { %6 = vsyncpa [#allocation3], 0  ;;  %13 = vst [vmem:[#allocation1] ss:$2 sm:$0xff] %v9_v0  ;;  %vm24_vm0 = vcmask 1043456   ;;  %vm255_vm15 = vcmask 1040384  }
   0x3   :  { %17 = vst [vmem:[#allocation1 + $0x10] ss:$2 sm:$0xff] %v10_v1  ;;  %s340_s0 = smov [#allocation2]   ;;  %s282_s13 = sshll.u32 %s452_s1, 4  ;;  %s283_s13 = int_to_ptr.hbm [resolvable:$true] %s282_s13 }
   0x4   :  { %s280_s10 = sshll.u32 %s340_s0, 4  ;;  %s281_s10 = int_to_ptr.vmem [resolvable:$true] %s280_s10 }
   0x9   :  { %v14_v2 = vld.sshfl [vmem:[#allocation1] sm:$0xff pattern:$0x75316420]  ;;  %v15_v3 = vld.sshfl [vmem:[#allocation1 + $0x8] sm:$0xff pattern:$0x75316420] }
   0xa   :  { %v18_v4 = vld.sshfl [vmem:[#allocation1 + $0x10] sm:$0xff pattern:$0x75316420]  ;;  %v19_v5 = vld.sshfl [vmem:[#allocation1 + $0x18] sm:$0xff pattern:$0x75316420] }
   0xb   :  { %v25_v6 = vsel %vm24_vm0, %v14_v2, -inf  ;;  %v32_v7 = vsel %vm24_vm0, %v15_v3, -inf  ;;  %v39_v8 = vsel %vm24_vm0, %v18_v4, -inf  ;;  %v46_v9 = vsel %vm24_vm0, %v19_v5, -inf }
   0xc   :  { %v26_v10 = vrot.slane %v25_v6, 4  ;;  %v33_v11 = vrot.slane %v32_v7, 4  ;;  %v40_v12 = vrot.slane %v39_v8, 4  ;;  %v47_v13 = vrot.slane %v46_v9, 4 }
   0xe   :  { %v27_v14 = vmax.f32 %v25_v6, %v26_v10  ;;  %v34_v15 = vmax.f32 %v32_v7, %v33_v11  ;;  %v41_v16 = vmax.f32 %v39_v8, %v40_v12  ;;  %v48_v17 = vmax.f32 %v46_v9, %v47_v13 }
  0x10   :  { %v28_v18 = vrot.slane %v27_v14, 2  ;;  %v35_v19 = vrot.slane %v34_v15, 2  ;;  %v42_v20 = vrot.slane %v41_v16, 2  ;;  %v49_v21 = vrot.slane %v48_v17, 2 }
  0x12   :  { %v29_v22 = vmax.f32 %v27_v14, %v28_v18  ;;  %v36_v23 = vmax.f32 %v34_v15, %v35_v19  ;;  %v43_v24 = vmax.f32 %v41_v16, %v42_v20  ;;  %v50_v25 = vmax.f32 %v48_v17, %v49_v21 }
  0x14   :  { %v30_v26 = vrot.slane %v29_v22, 1  ;;  %v37_v27 = vrot.slane %v36_v23, 1  ;;  %v44_v28 = vrot.slane %v43_v24, 1  ;;  %v51_v29 = vrot.slane %v50_v25, 1 }
  0x16   :  { %v31_v30 = vmax.f32 %v29_v22, %v30_v26  ;;  %v38_v31 = vmax.f32 %v36_v23, %v37_v27  ;;  %v45_v32 = vmax.f32 %v43_v24, %v44_v28  ;;  %v52_v33 = vmax.f32 %v50_v25, %v51_v29 }
  0x18   :  { %v57_v34 = vrot.slane %v38_v31, 4  ;;  %v58_v35 = vrot.slane %v52_v33, 4 }
  0x1a   :  { %v59_v36 = vsel %vm24_vm0, %v31_v30, %v57_v34  ;;  %v60_v37 = vsel %vm24_vm0, %v45_v32, %v58_v35 }
  0x1b   :  { %v63_v38 = vsub.f32 %v9_v0, %v59_v36  ;;  %v64_v39 = vsub.f32 %v10_v1, %v60_v37 }
  0x1d   :  { %v65_v40 = vmul.f32 1.442695, %v63_v38  ;;  %v67_v41 = vmul.f32 1.442695, %v64_v39 }
  0x1f   :  { %294 = vpow2.f32 %v65_v40 }
  0x20   :  { %296 = vpow2.f32 %v67_v41 }
  0x25   :  { %v295_v42 = vpop.eup %294 }
  0x26   :  { %v297_v43 = vpop.eup %296  ;;  %71 = vst [vmem:[#allocation1] ss:$2 sm:$0xff] %v295_v42  ;;  %v110_v44 = vmul.f32 %v295_v42, %v63_v38 }
  0x27   :  { %75 = vst [vmem:[#allocation1 + $0x10] ss:$2 sm:$0xff] %v297_v43  ;;  %v111_v45 = vmul.f32 %v297_v43, %v64_v39 }
  0x2d   :  { %v72_v46 = vld.sshfl [vmem:[#allocation1] sm:$0xff pattern:$0x75316420]  ;;  %v73_v47 = vld.sshfl [vmem:[#allocation1 + $0x8] sm:$0xff pattern:$0x75316420] }
  0x2e   :  { %v76_v48 = vld.sshfl [vmem:[#allocation1 + $0x10] sm:$0xff pattern:$0x75316420]  ;;  %v77_v49 = vld.sshfl [vmem:[#allocation1 + $0x18] sm:$0xff pattern:$0x75316420] }
  0x2f   :  { %v82_v50 = vsel %vm24_vm0, %v72_v46, 0.0  ;;  %v89_v51 = vsel %vm24_vm0, %v73_v47, 0.0  ;;  %v96_v52 = vsel %vm24_vm0, %v76_v48, 0.0  ;;  %v103_v53 = vsel %vm24_vm0, %v77_v49, 0.0  ;;  %114 = vst [vmem:[#allocation1] ss:$2 sm:$0xff] %v110_v44 }
  0x30   :  { %v83_v54 = vrot.slane %v82_v50, 4  ;;  %v90_v55 = vrot.slane %v89_v51, 4  ;;  %v97_v56 = vrot.slane %v96_v52, 4  ;;  %v104_v57 = vrot.slane %v103_v53, 4  ;;  %118 = vst [vmem:[#allocation1 + $0x10] ss:$2 sm:$0xff] %v111_v45 }
  0x32   :  { %v84_v58 = vadd.f32 %v83_v54, %v82_v50  ;;  %v91_v59 = vadd.f32 %v90_v55, %v89_v51  ;;  %v98_v60 = vadd.f32 %v97_v56, %v96_v52  ;;  %v105_v61 = vadd.f32 %v104_v57, %v103_v53 }
  0x34   :  { %v85_v62 = vrot.slane %v84_v58, 2  ;;  %v92_v63 = vrot.slane %v91_v59, 2  ;;  %v99_v0 = vrot.slane %v98_v60, 2  ;;  %v106_v1 = vrot.slane %v105_v61, 2 }
  0x36   :  { %v86_v2 = vadd.f32 %v85_v62, %v84_v58  ;;  %v93_v3 = vadd.f32 %v92_v63, %v91_v59  ;;  %v100_v4 = vadd.f32 %v99_v0, %v98_v60  ;;  %v115_v5 = vld.sshfl [vmem:[#allocation1] sm:$0xff pattern:$0x75316420]  ;;  %v116_v6 = vld.sshfl [vmem:[#allocation1 + $0x8] sm:$0xff pattern:$0x75316420]  ;;  %v107_v18 = vadd.f32 %v106_v1, %v105_v61 }
  0x37   :  { %v119_v7 = vld.sshfl [vmem:[#allocation1 + $0x10] sm:$0xff pattern:$0x75316420]  ;;  %v120_v8 = vld.sshfl [vmem:[#allocation1 + $0x18] sm:$0xff pattern:$0x75316420] }
  0x38   :  { %v87_v9 = vrot.slane %v86_v2, 1  ;;  %v94_v10 = vrot.slane %v93_v3, 1  ;;  %v101_v11 = vrot.slane %v100_v4, 1  ;;  %v125_v12 = vsel %vm24_vm0, %v115_v5, 0.0 }
  0x39   :  { %v132_v13 = vsel %vm24_vm0, %v116_v6, 0.0  ;;  %v139_v14 = vsel %vm24_vm0, %v119_v7, 0.0  ;;  %v146_v15 = vsel %vm24_vm0, %v120_v8, 0.0  ;;  %v126_v19 = vrot.slane %v125_v12, 4 }
  0x3a   :  { %v88_v16 = vadd.f32 %v87_v9, %v86_v2  ;;  %v371_v17 = vadd.f32 %v94_v10, %v93_v3  ;;  %v133_v20 = vrot.slane %v132_v13, 4  ;;  %v140_v21 = vrot.slane %v139_v14, 4 }
  0x3b   :  { %v147_v22 = vrot.slane %v146_v15, 4  ;;  %v373_v23 = vadd.f32 %v101_v11, %v100_v4  ;;  %v127_v24 = vadd.f32 %v126_v19, %v125_v12  ;;  %v108_v28 = vrot.slane %v107_v18, 1 }
  0x3c   :  { %298 = vrcp.f32 %v88_v16  ;;  %v134_v25 = vadd.f32 %v133_v20, %v132_v13  ;;  %v141_v26 = vadd.f32 %v140_v21, %v139_v14  ;;  %v162_v29 = vand.u32 2147483647, %v88_v16 }
  0x3d   :  { %v148_v27 = vadd.f32 %v147_v22, %v146_v15  ;;  %v164_v30 = vand.u32 2147483648, %v88_v16  ;;  %300 = vrcp.f32 %v371_v17  ;;  %v128_v31 = vrot.slane %v127_v24, 2 }
  0x3e   :  { %v135_v32 = vrot.slane %v134_v25, 2  ;;  %v142_v33 = vrot.slane %v141_v26, 2  ;;  %v177_v35 = vand.u32 2147483647, %v371_v17  ;;  %302 = vrcp.f32 %v373_v23 }
  0x3f   :  { %v149_v34 = vrot.slane %v148_v27, 2  ;;  %v129_v36 = vadd.f32 %v128_v31, %v127_v24  ;;  %v179_v37 = vand.u32 2147483648, %v371_v17  ;;  %v379_v39 = vadd.f32 %v108_v28, %v107_v18 }
  0x40   :  { %vm158_vm1 = vweird.f32 %v88_v16  ;;  %vm381_vm2 = vcmp.eq.f32.partialorder %v162_v29, 8.507059e+37  ;;  %v136_v41 = vadd.f32 %v135_v32, %v134_v25  ;;  %v143_v42 = vadd.f32 %v142_v33, %v141_v26 }
  0x41   :  { %v385_v43 = vadd.f32 %v149_v34, %v148_v27  ;;  %v165_v44 = vor.u32 1.1754944e-38, %v164_v30  ;;  %vm173_vm3 = vweird.f32 %v371_v17  ;;  %vm388_vm4 = vcmp.eq.f32.partialorder %v177_v35, 8.507059e+37 }
  0x42   :  { %v299_v38 = vpop.eup %298  ;;  %vm188_vm5 = vweird.f32 %v373_v23  ;;  %v130_v48 = vrot.slane %v129_v36, 1  ;;  %v180_v49 = vor.u32 1.1754944e-38, %v179_v37  ;;  %v192_v50 = vand.u32 2147483647, %v373_v23 }
  0x43   :  { %v301_v45 = vpop.eup %300  ;;  %v154_v46 = vmul.f32 %v299_v38, %v88_v16  ;;  %v194_v51 = vand.u32 2147483648, %v373_v23  ;;  %vm159_vm6 = vweird.f32 %v299_v38  ;;  %304 = vrcp.f32 %v379_v39 }
  0x44   :  { %v303_v52 = vpop.eup %302  ;;  %v169_v54 = vmul.f32 %v301_v45, %v371_v17  ;;  %v137_v55 = vrot.slane %v136_v41, 1  ;;  %v144_v56 = vrot.slane %v143_v42, 1  ;;  %v151_v57 = vrot.slane %v385_v43, 1  ;;  %vm400_vm8 = vmor %vm158_vm1, %vm159_vm6 }
  0x45   :  { %v155_v53 = vsub.f32 1.0, %v154_v46  ;;  %v184_v58 = vmul.f32 %v303_v52, %v373_v23  ;;  %vm174_vm7 = vweird.f32 %v301_v45  ;;  %306 = vlog2.f32 %v88_v16 }
  0x46   :  { %v170_v60 = vsub.f32 1.0, %v169_v54  ;;  %vm189_vm9 = vweird.f32 %v303_v52  ;;  %vm404_vm10 = vcmp.eq.f32.partialorder %v192_v50, 8.507059e+37  ;;  %308 = vlog2.f32 %v371_v17  ;;  %vm412_vm11 = vmor %vm173_vm3, %vm174_vm7 }
  0x47   :  { %v156_v59 = vmul.f32 %v299_v38, %v155_v53  ;;  %v185_v62 = vsub.f32 1.0, %v184_v58  ;;  %v131_v0 = vadd.f32 %v130_v48, %v129_v36  ;;  %310 = vlog2.f32 %v373_v23  ;;  %vm421_vm12 = vmor %vm188_vm5, %vm189_vm9 }
  0x48   :  { %v171_v2 = vmul.f32 %v301_v45, %v170_v60  ;;  %v138_v3 = vadd.f32 %v137_v55, %v136_v41  ;;  %v145_v4 = vadd.f32 %v144_v56, %v143_v42  ;;  %v195_v7 = vor.u32 1.1754944e-38, %v194_v51 }
  0x49   :  { %v157_v1 = vadd.f32 %v299_v38, %v156_v59  ;;  %v186_v6 = vmul.f32 %v303_v52, %v185_v62  ;;  %v305_v8 = vpop.eup %304  ;;  %vm203_vm13 = vweird.f32 %v379_v39  ;;  %312 = vlog2.f32 %v379_v39 }
  0x4a   :  { %v172_v10 = vadd.f32 %v301_v45, %v171_v2  ;;  %v199_v14 = vmul.f32 %v305_v8, %v379_v39  ;;  %v207_v15 = vand.u32 2147483647, %v379_v39  ;;  %vm204_vm14 = vweird.f32 %v305_v8 }
  0x4b   :  { %v161_v9 = vsel %vm400_vm8, %v299_v38, %v157_v1  ;;  %v187_v13 = vadd.f32 %v303_v52, %v186_v6  ;;  %v307_v16 = vpop.eup %306  ;;  %v209_v19 = vand.u32 2147483648, %v379_v39  ;;  %v152_v34 = vadd.f32 %v151_v57, %v385_v43  ;;  %vm205_vm0 = vmor %vm203_vm13, %vm204_vm14 }
  0x4c   :  { %v166_v12 = vsel %vm381_vm2, %v165_v44, %v161_v9  ;;  %v176_v18 = vsel %vm412_vm11, %v301_v45, %v172_v10  ;;  %v309_v20 = vpop.eup %308  ;;  %v200_v23 = vsub.f32 1.0, %v199_v14  ;;  %v214_v24 = vmul.f32 0.6931472, %v307_v16 }
  0x4d   :  { %v167_v17 = vmul.f32 %v166_v12, %v131_v0  ;;  %v181_v21 = vsel %vm388_vm4, %v180_v49, %v176_v18  ;;  %v191_v22 = vsel %vm421_vm12, %v303_v52, %v187_v13  ;;  %v311_v25 = vpop.eup %310  ;;  %v216_v28 = vmul.f32 0.6931472, %v309_v20 }
  0x4e   :  { %v182_v26 = vmul.f32 %v181_v21, %v138_v3  ;;  %v196_v27 = vsel %vm404_vm10, %v195_v7, %v191_v22  ;;  %v201_v30 = vmul.f32 %v305_v8, %v200_v23  ;;  %v218_v31 = vmul.f32 0.6931472, %v311_v25 }
  0x4f   :  { %v197_v29 = vmul.f32 %v196_v27, %v145_v4  ;;  %v221_v32 = vsub.f32 %v167_v17, %v214_v24  ;;  %v313_v33 = vpop.eup %312  ;;  %v210_v35 = vor.u32 1.1754944e-38, %v209_v19  ;;  %vm208_vm1 = vcmp.eq.f32.partialorder %v207_v15, 8.507059e+37 }
  0x50   :  { %v222_v36 = vsub.f32 %v182_v26, %v216_v28  ;;  %v202_v37 = vadd.f32 %v305_v8, %v201_v30  ;;  %v220_v44 = vmul.f32 0.6931472, %v313_v33  ;;  %vm273_vm2 = vcmask 0  }
  0x51   :  { %v223_v38 = vsub.f32 %v197_v29, %v218_v31  ;;  %v256_v40 = vsel %vm255_vm15, %v221_v32, 0.0 }
  0x52   :  { %v257_v41 = vsel %vm255_vm15, %v222_v36, 0.0  ;;  %v206_v42 = vsel %vm205_vm0, %v305_v8, %v202_v37 }
  0x53   :  { %v258_v45 = vadd.f32 %v257_v41, %v256_v40  ;;  %v259_v46 = vsel %vm255_vm15, %v223_v38, 0.0  ;;  %v211_v47 = vsel %vm208_vm1, %v210_v35, %v206_v42 }
  0x54   :  { %v212_v43 = vmul.f32 %v211_v47, %v152_v34 }
  0x55   :  { %v260_v48 = vadd.f32 %v259_v46, %v258_v45 }
  0x56   :  { %v224_v49 = vsub.f32 %v212_v43, %v220_v44 }
  0x58   :  { %v261_v39 = vsel %vm255_vm15, %v224_v49, 0.0 }
  0x59   :  { %v262_v50 = vadd.f32 %v261_v39, %v260_v48 }
  0x5b   :  { %263 = vadd.xlane.f32.xlu0 %v262_v50 }
  0xce   :  { %v264_v51 = vpop.xlane.xlu0 %263 }
  0xcf   :  { %v265_v52 = vrot.slane %v264_v51, 4 }
  0xd1   :  { %v266_v53 = vadd.f32 %v265_v52, %v264_v51 }
  0xd3   :  { %v267_v54 = vrot.slane %v266_v53, 2 }
  0xd5   :  { %v268_v55 = vadd.f32 %v267_v54, %v266_v53 }
  0xd7   :  { %v269_v56 = vrot.slane %v268_v55, 1 }
  0xd9   :  { %v270_v57 = vadd.f32 %v269_v56, %v268_v55 }
  0xdb   :  { %291 = vpush %v270_v57 }
 0x10c   :  { %s292_s14 = spop %291 }
 0x10d   :  { %v272_v58 = vstv %s292_s14 }
 0x10e   :  { %274 = vst.msk [vmem:[#allocation2] sm:$0x1] %vm273_vm2, %v272_v58 }
 0x10f   :  { %285 = dma.vmem_to_hbm [thread:$0]  %s281_s10, 16, %s283_s13, [#allocation3]  }
 0x110   :  { %338 = dma.done.wait [#allocation3], 16  }
 0x111   :  { %339 = vsyncadd [#allocation3], 4294967280 }
 0x112   :  { %290 = vsyncpa [#allocation3], 1 }

</bundles_post_ra>
